<compile_context>
chip_gen: v5e
topology: v5e:2x2
jax: 0.10.0
libtpu: 0.0.40
codegen_flags: <defaults>
</compile_context>

<pallas_src>
import functools

import jax
import jax.numpy as jnp
from jax.experimental import pallas as pl
from jax.experimental.pallas import tpu as pltpu

LANE = 128
SUB = 8


def _round_up(v, m):
    return (v + m - 1) // m * m


def gcl_kernel(rows_ref, cols_ref, rowl_ref,
               xw1a_ref, xw1b_ref, be1_ref, we2_ref, be2_ref,
               xwn1a_ref, wn1b_ref, bn1_ref, wn2_ref, bn2_ref,
               xout_ref, ef_ref,
               agg_ref, idg_ref, ids_ref):
    eb = pl.program_id(0)
    TE, Np = idg_ref.shape
    bf = jnp.bfloat16

    @pl.when(eb == 0)
    def _init():
        agg_ref[...] = jnp.zeros_like(agg_ref)
        # Grid-invariant node-id iotas, staged once and reused every edge block.
        idg_ref[...] = jax.lax.broadcasted_iota(jnp.int32, (TE, Np), 1)
        ids_ref[...] = jax.lax.broadcasted_iota(jnp.int32, (Np, TE), 0)

    # One-hots built on the VPU, each already in the orientation its matmul
    # needs (no transposed-LHS dot_general / XLU transpose inside the loop).
    # Padded edges carry node id == Np -> all-zero one-hot row/column.
    oh_row_g = (idg_ref[...] == rows_ref[...]).astype(bf)   # (TE, Np)  gather
    oh_col_g = (idg_ref[...] == cols_ref[...]).astype(bf)   # (TE, Np)  gather
    oh_row_s = (ids_ref[...] == rowl_ref[...]).astype(bf)   # (Np, TE)  segsum

    # Edge MLP layer 1, reassociated through the gather:
    #   h1 = (x @ We1a)[row] + (x @ We1b)[col] + be1
    # xW1a / xW1b are precomputed once in the wrapper; a bf16 one-hot matmul
    # with f32 accumulation is an exact gather of the bf16 table values.
    h1 = (jnp.dot(oh_row_g, xw1a_ref[...], preferred_element_type=jnp.float32)
          + jnp.dot(oh_col_g, xw1b_ref[...], preferred_element_type=jnp.float32)
          + be1_ref[...])
    h1 = jnp.maximum(h1, 0.0)

    # Edge MLP layer 2 (the only large per-block matmul).
    ef = jnp.dot(h1.astype(bf), we2_ref[...],
                 preferred_element_type=jnp.float32) + be2_ref[...]
    ef = jnp.maximum(ef, 0.0)                                 # (TE, HdP)
    ef_ref[...] = ef

    # unsorted_segment_sum(edge_feat, row, N) as a plain (Np,TE)@(TE,HdP) matmul.
    agg_ref[...] += jnp.dot(oh_row_s, ef.astype(bf),
                            preferred_element_type=jnp.float32)

    # Node MLP runs once, after the last edge block has been accumulated.
    @pl.when(eb == pl.num_programs(0) - 1)
    def _finalize():
        n1 = (xwn1a_ref[...]
              + jnp.dot(agg_ref[...].astype(bf), wn1b_ref[...],
                        preferred_element_type=jnp.float32)
              + bn1_ref[...])
        n1 = jnp.maximum(n1, 0.0)
        xout_ref[...] = (jnp.dot(n1.astype(bf), wn2_ref[...],
                                 preferred_element_type=jnp.float32)
                         + bn2_ref[...])


def gcl_forward(x, edge_index, params, *, edge_tile=1024):
    """x: (N, H) f32, edge_index: (2, E) int. Returns (x_out (N,Hout), edge_feat (E,Hd))."""
    N, H = x.shape
    E = edge_index.shape[1]
    Hd = params["we2"].shape[1]
    Hout = params["wn2"].shape[1]

    Np = _round_up(N, SUB)
    HdP = _round_up(Hd, LANE)
    HoutP = _round_up(Hout, LANE)

    # Edge tiling: single block if everything fits, otherwise 128-multiple tiles.
    E8 = _round_up(E, SUB)
    TE = E8 if E8 <= edge_tile else _round_up(edge_tile, LANE)
    E_pad = _round_up(E8, TE)
    n_eblocks = E_pad // TE

    f32, bf = jnp.float32, jnp.bfloat16

    def pad2(a, r, c):
        return jnp.pad(a, ((0, r - a.shape[0]), (0, c - a.shape[1])))

    def mm(a, w):
        return jnp.dot(a.astype(bf), w.astype(bf), preferred_element_type=f32)

    # Grid-invariant per-node precompute (reassociates the one-hot gather
    # through the layer-1 weights): tiny O(N*H*Hd) XLA matmuls.
    xw1a = pad2(mm(x, params["we1"][:H]), Np, HdP).astype(bf)   # (Np, HdP) bf16
    xw1b = pad2(mm(x, params["we1"][H:]), Np, HdP).astype(bf)   # (Np, HdP) bf16
    xwn1a = pad2(mm(x, params["wn1"][:H]), Np, HdP)             # (Np, HdP) f32

    # Edge indices; padded edges get node id == Np (all-zero one-hot).
    ridx = edge_index[0].astype(jnp.int32)
    cidx = edge_index[1].astype(jnp.int32)
    row_s = jnp.full((E_pad, 1), Np, jnp.int32).at[:E, 0].set(ridx)
    col_s = jnp.full((E_pad, 1), Np, jnp.int32).at[:E, 0].set(cidx)
    row_l = jnp.full((1, E_pad), Np, jnp.int32).at[0, :E].set(ridx)

    we2 = pad2(params["we2"], HdP, HdP).astype(bf)
    wn1b = pad2(params["wn1"][H:], HdP, HdP).astype(bf)
    wn2 = pad2(params["wn2"], HdP, HoutP).astype(bf)
    be1 = pad2(params["be1"], 1, HdP)
    be2 = pad2(params["be2"], 1, HdP)
    bn1 = pad2(params["bn1"], 1, HdP)
    bn2 = pad2(params["bn2"], 1, HoutP)

    def rep(shape):
        nd = len(shape)
        return pl.BlockSpec(shape, lambda e, _n=nd: (0,) * _n)

    in_specs = [
        pl.BlockSpec((TE, 1), lambda e: (e, 0)),          # row (sublane form, gather)
        pl.BlockSpec((TE, 1), lambda e: (e, 0)),          # col (sublane form, gather)
        pl.BlockSpec((1, TE), lambda e: (0, e)),          # row (lane form, segsum)
        rep((Np, HdP)), rep((Np, HdP)), rep((1, HdP)),    # xW1a, xW1b, be1
        rep((HdP, HdP)), rep((1, HdP)),                   # we2, be2
        rep((Np, HdP)), rep((HdP, HdP)), rep((1, HdP)),   # xWn1a, wn1b, bn1
        rep((HdP, HoutP)), rep((1, HoutP)),               # wn2, bn2
    ]
    out_specs = (
        pl.BlockSpec((Np, HoutP), lambda e: (0, 0)),      # x_out (resident, written last)
        pl.BlockSpec((TE, HdP), lambda e: (e, 0)),        # edge_feat (per edge block)
    )

    flops = 2 * (2 * E_pad * Np * HdP        # reassociated one-hot gathers
                 + E_pad * HdP * HdP         # edge MLP layer 2
                 + E_pad * Np * HdP          # segment-sum matmul
                 + Np * HdP * HdP            # node MLP layer 1 (agg part)
                 + Np * HdP * HoutP)         # node MLP layer 2
    bytes_accessed = (3 * E_pad * 4
                      + 2 * Np * HdP * 2 + Np * HdP * 4
                      + (2 * HdP * HdP + HdP * HoutP) * 2
                      + (3 * HdP + HoutP) * 4
                      + Np * HoutP * 4 + E_pad * HdP * 4)
    cost = pl.CostEstimate(flops=int(flops), transcendentals=0,
                           bytes_accessed=int(bytes_accessed))

    xout_p, ef_p = pl.pallas_call(
        gcl_kernel,
        grid=(n_eblocks,),
        out_shape=(jax.ShapeDtypeStruct((Np, HoutP), f32),
                   jax.ShapeDtypeStruct((E_pad, HdP), f32)),
        in_specs=in_specs,
        out_specs=out_specs,
        scratch_shapes=[pltpu.VMEM((Np, HdP), f32),        # segment-sum accumulator
                        pltpu.VMEM((TE, Np), jnp.int32),   # gather-side node ids
                        pltpu.VMEM((Np, TE), jnp.int32)],  # segsum-side node ids
        compiler_params=pltpu.CompilerParams(
            dimension_semantics=("arbitrary",),            # edge axis reduces into agg
            vmem_limit_bytes=32 * 1024 * 1024),
        cost_estimate=cost,
    )(row_s, col_s, row_l, xw1a, xw1b, be1, we2, be2,
      xwn1a, wn1b, bn1, wn2, bn2)

    return xout_p[:N, :Hout], ef_p[:E, :Hd]


def init_params(key, in_nf, hidden_nf, out_nf):
    """Deterministic nn.Linear-style init: U(-1/sqrt(fan_in), +1/sqrt(fan_in))."""
    def linear(k, fan_in, fan_out):
        kw, kb = jax.random.split(k)
        bound = 1.0 / jnp.sqrt(fan_in)
        w = jax.random.uniform(kw, (fan_in, fan_out), jnp.float32, -bound, bound)
        b = jax.random.uniform(kb, (1, fan_out), jnp.float32, -bound, bound)
        return w, b

    k1, k2, k3, k4 = jax.random.split(key, 4)
    we1, be1 = linear(k1, 2 * in_nf, hidden_nf)
    we2, be2 = linear(k2, hidden_nf, hidden_nf)
    wn1, bn1 = linear(k3, in_nf + hidden_nf, hidden_nf)
    wn2, bn2 = linear(k4, hidden_nf, out_nf)
    return dict(we1=we1, be1=be1, we2=we2, be2=be2,
                wn1=wn1, bn1=bn1, wn2=wn2, bn2=bn2)


def gcl_forward_ref(x, edge_index, p):
    """Pure-JAX f32 reference of the PyTorch module's forward semantics."""
    row, col = edge_index[0], edge_index[1]
    src, tgt = x[row], x[col]
    ein = jnp.concatenate([src, tgt], axis=1)
    h1 = jnp.maximum(ein @ p["we1"] + p["be1"], 0.0)
    ef = jnp.maximum(h1 @ p["we2"] + p["be2"], 0.0)
    agg = jnp.zeros((x.shape[0], ef.shape[1]), jnp.float32).at[row].add(ef)
    nin = jnp.concatenate([x, agg], axis=1)
    n1 = jnp.maximum(nin @ p["wn1"] + p["bn1"], 0.0)
    xout = n1 @ p["wn2"] + p["bn2"]
    return xout, ef


def gcl_forward_ref_bf16(x, edge_index, p):
    """Reference mirroring the kernel's bf16 matmul operands / f32 accumulation
    and the gather-after-layer-1 reassociation."""
    H = x.shape[1]
    bf, f32 = jnp.bfloat16, jnp.float32

    def mm(a, w):
        return jnp.dot(a.astype(bf), w.astype(bf), preferred_element_type=f32)

    row, col = edge_index[0], edge_index[1]
    xw1a = mm(x, p["we1"][:H]).astype(bf).astype(f32)
    xw1b = mm(x, p["we1"][H:]).astype(bf).astype(f32)
    h1 = jnp.maximum(xw1a[row] + xw1b[col] + p["be1"], 0.0)
    ef = jnp.maximum(mm(h1, p["we2"]) + p["be2"], 0.0)
    agg = jnp.zeros((x.shape[0], ef.shape[1]), f32).at[row].add(
        ef.astype(bf).astype(f32))
    xwn1a = mm(x, p["wn1"][:H])
    n1 = jnp.maximum(xwn1a + mm(agg, p["wn1"][H:]) + p["bn1"], 0.0)
    xout = mm(n1, p["wn2"]) + p["bn2"]
    return xout, ef


if __name__ == "__main__":
    key = jax.random.PRNGKey(0)
    k_x, k_p = jax.random.split(key)

    N, H, Hd = 8, 32, 32          # num_nodes, input_nf, hidden_nf (= output_nf)
    # Fully connected graph without self-loops -> E = N*(N-1) = 56 edges.
    rows, cols = [], []
    for i in range(N):
        for j in range(N):
            if i != j:
                rows.append(i)
                cols.append(j)
    edge_index = jnp.array([rows, cols], dtype=jnp.int32)   # (2, 56)

    x = jax.random.normal(k_x, (N, H), jnp.float32)
    params = init_params(k_p, H, Hd, H)

    fwd = jax.jit(functools.partial(gcl_forward, edge_tile=1024))
    x_out, edge_feat = fwd(x, edge_index, params)
    jax.block_until_ready((x_out, edge_feat))

    assert x_out.shape == (N, H) and edge_feat.shape == (edge_index.shape[1], Hd)

    # Tight check vs a reference with the same bf16 matmul-operand casts.
    xb_ref, efb_ref = gcl_forward_ref_bf16(x, edge_index, params)
    assert jnp.allclose(edge_feat, efb_ref, atol=5e-3, rtol=5e-3)
    assert jnp.allclose(x_out, xb_ref, atol=5e-3, rtol=5e-3)

    # Loose sanity check vs the full-f32 (PyTorch-equivalent) reference.
    xf_ref, eff_ref = gcl_forward_ref(x, edge_index, params)
    assert jnp.allclose(edge_feat, eff_ref, atol=1e-1, rtol=1e-1)
    assert jnp.allclose(x_out, xf_ref, atol=1e-1, rtol=1e-1)

    print("KERNEL_OK")
</pallas_src>

<mosaic_0001>
module attributes {stable_mosaic.version = 11 : i64} {
  func.func @gcl_kernel(%arg0: i32, %arg1: memref<56x1xi32, #tpu.memory_space<vmem>>, %arg2: memref<56x1xi32, #tpu.memory_space<vmem>>, %arg3: memref<1x56xi32, #tpu.memory_space<vmem>>, %arg4: memref<8x128xbf16, #tpu.memory_space<vmem>>, %arg5: memref<8x128xbf16, #tpu.memory_space<vmem>>, %arg6: memref<1x128xf32, #tpu.memory_space<vmem>>, %arg7: memref<128x128xbf16, #tpu.memory_space<vmem>>, %arg8: memref<1x128xf32, #tpu.memory_space<vmem>>, %arg9: memref<8x128xf32, #tpu.memory_space<vmem>>, %arg10: memref<128x128xbf16, #tpu.memory_space<vmem>>, %arg11: memref<1x128xf32, #tpu.memory_space<vmem>>, %arg12: memref<128x128xbf16, #tpu.memory_space<vmem>>, %arg13: memref<1x128xf32, #tpu.memory_space<vmem>>, %arg14: memref<8x128xf32, #tpu.memory_space<vmem>>, %arg15: memref<56x128xf32, #tpu.memory_space<vmem>>, %arg16: memref<8x128xf32, #tpu.memory_space<vmem>>, %arg17: memref<56x8xi32, #tpu.memory_space<vmem>>, %arg18: memref<8x56xi32, #tpu.memory_space<vmem>>) attributes {dimension_semantics = [#tpu.dimension_semantics<arbitrary>], iteration_bounds = array<i64: 1>, scalar_prefetch = 0 : i64, scratch_operands = 3 : i64, tpu.core_type = #tpu.core_type<tc>, window_params = [{transform_indices = @transform_0, window_bounds = array<i64: 56, 1>}, {transform_indices = @transform_1, window_bounds = array<i64: 56, 1>}, {transform_indices = @transform_2, window_bounds = array<i64: 1, 56>}, {pipeline_mode = #tpu.pipeline_mode<synchronous>, transform_indices = @transform_3, window_bounds = array<i64: 8, 128>}, {pipeline_mode = #tpu.pipeline_mode<synchronous>, transform_indices = @transform_4, window_bounds = array<i64: 8, 128>}, {pipeline_mode = #tpu.pipeline_mode<synchronous>, transform_indices = @transform_5, window_bounds = array<i64: 1, 128>}, {pipeline_mode = #tpu.pipeline_mode<synchronous>, transform_indices = @transform_6, window_bounds = array<i64: 128, 128>}, {pipeline_mode = #tpu.pipeline_mode<synchronous>, transform_indices = @transform_7, window_bounds = array<i64: 1, 128>}, {pipeline_mode = #tpu.pipeline_mode<synchronous>, transform_indices = @transform_8, window_bounds = array<i64: 8, 128>}, {pipeline_mode = #tpu.pipeline_mode<synchronous>, transform_indices = @transform_9, window_bounds = array<i64: 128, 128>}, {pipeline_mode = #tpu.pipeline_mode<synchronous>, transform_indices = @transform_10, window_bounds = array<i64: 1, 128>}, {pipeline_mode = #tpu.pipeline_mode<synchronous>, transform_indices = @transform_11, window_bounds = array<i64: 128, 128>}, {pipeline_mode = #tpu.pipeline_mode<synchronous>, transform_indices = @transform_12, window_bounds = array<i64: 1, 128>}, {pipeline_mode = #tpu.pipeline_mode<synchronous>, transform_indices = @transform_13, window_bounds = array<i64: 8, 128>}, {transform_indices = @transform_14, window_bounds = array<i64: 56, 128>}]} {
    %c0_i32 = arith.constant 0 : i32
    %0 = arith.cmpi eq, %arg0, %c0_i32 : i32
    %1 = arith.extui %0 : i1 to i32
    %c0_i32_0 = arith.constant 0 : i32
    %2 = arith.cmpi ne, %1, %c0_i32_0 : i32
    scf.if %2 {
      %cst_35 = arith.constant 0.000000e+00 : f32
      %51 = vector.broadcast %cst_35 : f32 to vector<8x128xf32>
      %c0_36 = arith.constant 0 : index
      %c0_37 = arith.constant 0 : index
      %52 = vector.load %arg16[%c0_36, %c0_37] : memref<8x128xf32, #tpu.memory_space<vmem>>, vector<8x128xf32>
      tpu.vector_store %arg16[%c0_36, %c0_37], %51 {strides = array<i32>} : memref<8x128xf32, #tpu.memory_space<vmem>>, vector<8x128xf32>,
      %53 = tpu.iota {dimensions = array<i32: 1>} : vector<56x8xi32>
      %c0_38 = arith.constant 0 : index
      %c0_39 = arith.constant 0 : index
      %54 = vector.load %arg17[%c0_38, %c0_39] : memref<56x8xi32, #tpu.memory_space<vmem>>, vector<56x8xi32>
      tpu.vector_store %arg17[%c0_38, %c0_39], %53 {strides = array<i32>} : memref<56x8xi32, #tpu.memory_space<vmem>>, vector<56x8xi32>,
      %55 = tpu.iota {dimensions = array<i32: 0>} : vector<8x56xi32>
      %c0_40 = arith.constant 0 : index
      %c0_41 = arith.constant 0 : index
      %56 = vector.load %arg18[%c0_40, %c0_41] : memref<8x56xi32, #tpu.memory_space<vmem>>, vector<8x56xi32>
      tpu.vector_store %arg18[%c0_40, %c0_41], %55 {strides = array<i32>} : memref<8x56xi32, #tpu.memory_space<vmem>>, vector<8x56xi32>,
    } else {
    }
    %c0 = arith.constant 0 : index
    %c0_1 = arith.constant 0 : index
    %3 = vector.load %arg17[%c0, %c0_1] : memref<56x8xi32, #tpu.memory_space<vmem>>, vector<56x8xi32>
    %c0_2 = arith.constant 0 : index
    %c0_3 = arith.constant 0 : index
    %4 = vector.load %arg1[%c0_2, %c0_3] : memref<56x1xi32, #tpu.memory_space<vmem>>, vector<56x1xi32>
    %5 = vector.broadcast %4 : vector<56x1xi32> to vector<56x8xi32>
    %6 = arith.cmpi eq, %3, %5 : vector<56x8xi32>
    %7 = arith.extui %6 : vector<56x8xi1> to vector<56x8xi32>
    %8 = arith.sitofp %7 : vector<56x8xi32> to vector<56x8xf32>
    %9 = arith.truncf %8 : vector<56x8xf32> to vector<56x8xbf16>
    %c0_4 = arith.constant 0 : index
    %c0_5 = arith.constant 0 : index
    %10 = vector.load %arg17[%c0_4, %c0_5] : memref<56x8xi32, #tpu.memory_space<vmem>>, vector<56x8xi32>
    %c0_6 = arith.constant 0 : index
    %c0_7 = arith.constant 0 : index
    %11 = vector.load %arg2[%c0_6, %c0_7] : memref<56x1xi32, #tpu.memory_space<vmem>>, vector<56x1xi32>
    %12 = vector.broadcast %11 : vector<56x1xi32> to vector<56x8xi32>
    %13 = arith.cmpi eq, %10, %12 : vector<56x8xi32>
    %14 = arith.extui %13 : vector<56x8xi1> to vector<56x8xi32>
    %15 = arith.sitofp %14 : vector<56x8xi32> to vector<56x8xf32>
    %16 = arith.truncf %15 : vector<56x8xf32> to vector<56x8xbf16>
    %c0_8 = arith.constant 0 : index
    %c0_9 = arith.constant 0 : index
    %17 = vector.load %arg18[%c0_8, %c0_9] : memref<8x56xi32, #tpu.memory_space<vmem>>, vector<8x56xi32>
    %c0_10 = arith.constant 0 : index
    %c0_11 = arith.constant 0 : index
    %18 = vector.load %arg3[%c0_10, %c0_11] : memref<1x56xi32, #tpu.memory_space<vmem>>, vector<1x56xi32>
    %19 = vector.broadcast %18 : vector<1x56xi32> to vector<8x56xi32>
    %20 = arith.cmpi eq, %17, %19 : vector<8x56xi32>
    %21 = arith.extui %20 : vector<8x56xi1> to vector<8x56xi32>
    %22 = arith.sitofp %21 : vector<8x56xi32> to vector<8x56xf32>
    %23 = arith.truncf %22 : vector<8x56xf32> to vector<8x56xbf16>
    %c0_12 = arith.constant 0 : index
    %c0_13 = arith.constant 0 : index
    %24 = vector.load %arg4[%c0_12, %c0_13] : memref<8x128xbf16, #tpu.memory_space<vmem>>, vector<8x128xbf16>
    %cst = arith.constant dense<0.000000e+00> : vector<56x128xf32>
    %25 = tpu.matmul %9, %24, %cst {dimension_numbers = #tpu.dot_dimension_numbers<[1], [0], [0], [1], [0, 0, 1, 1], [], []>} : vector<56x8xbf16>, vector<8x128xbf16>, vector<56x128xf32> -> vector<56x128xf32>
    %c0_14 = arith.constant 0 : index
    %c0_15 = arith.constant 0 : index
    %26 = vector.load %arg5[%c0_14, %c0_15] : memref<8x128xbf16, #tpu.memory_space<vmem>>, vector<8x128xbf16>
    %cst_16 = arith.constant dense<0.000000e+00> : vector<56x128xf32>
    %27 = tpu.matmul %16, %26, %cst_16 {dimension_numbers = #tpu.dot_dimension_numbers<[1], [0], [0], [1], [0, 0, 1, 1], [], []>} : vector<56x8xbf16>, vector<8x128xbf16>, vector<56x128xf32> -> vector<56x128xf32>
    %28 = arith.addf %25, %27 : vector<56x128xf32>
    %c0_17 = arith.constant 0 : index
    %c0_18 = arith.constant 0 : index
    %29 = vector.load %arg6[%c0_17, %c0_18] : memref<1x128xf32, #tpu.memory_space<vmem>>, vector<1x128xf32>
    %30 = vector.broadcast %29 : vector<1x128xf32> to vector<56x128xf32>
    %31 = arith.addf %28, %30 : vector<56x128xf32>
    %cst_19 = arith.constant 0.000000e+00 : f32
    %32 = vector.broadcast %cst_19 : f32 to vector<56x128xf32>
    %33 = arith.maximumf %31, %32 : vector<56x128xf32>
    %34 = arith.truncf %33 : vector<56x128xf32> to vector<56x128xbf16>
    %c0_20 = arith.constant 0 : index
    %c0_21 = arith.constant 0 : index
    %35 = vector.load %arg7[%c0_20, %c0_21] : memref<128x128xbf16, #tpu.memory_space<vmem>>, vector<128x128xbf16>
    %cst_22 = arith.constant dense<0.000000e+00> : vector<56x128xf32>
    %36 = tpu.matmul %34, %35, %cst_22 {dimension_numbers = #tpu.dot_dimension_numbers<[1], [0], [0], [1], [0, 0, 1, 1], [], []>} : vector<56x128xbf16>, vector<128x128xbf16>, vector<56x128xf32> -> vector<56x128xf32>
    %c0_23 = arith.constant 0 : index
    %c0_24 = arith.constant 0 : index
    %37 = vector.load %arg8[%c0_23, %c0_24] : memref<1x128xf32, #tpu.memory_space<vmem>>, vector<1x128xf32>
    %38 = vector.broadcast %37 : vector<1x128xf32> to vector<56x128xf32>
    %39 = arith.addf %36, %38 : vector<56x128xf32>
    %cst_25 = arith.constant 0.000000e+00 : f32
    %40 = vector.broadcast %cst_25 : f32 to vector<56x128xf32>
    %41 = arith.maximumf %39, %40 : vector<56x128xf32>
    %c0_26 = arith.constant 0 : index
    %c0_27 = arith.constant 0 : index
    %42 = vector.load %arg15[%c0_26, %c0_27] : memref<56x128xf32, #tpu.memory_space<vmem>>, vector<56x128xf32>
    tpu.vector_store %arg15[%c0_26, %c0_27], %41 {strides = array<i32>} : memref<56x128xf32, #tpu.memory_space<vmem>>, vector<56x128xf32>,
    %c0_28 = arith.constant 0 : index
    %c0_29 = arith.constant 0 : index
    %43 = vector.load %arg16[%c0_28, %c0_29] : memref<8x128xf32, #tpu.memory_space<vmem>>, vector<8x128xf32>
    %44 = arith.truncf %41 : vector<56x128xf32> to vector<56x128xbf16>
    %cst_30 = arith.constant dense<0.000000e+00> : vector<8x128xf32>
    %45 = tpu.matmul %23, %44, %cst_30 {dimension_numbers = #tpu.dot_dimension_numbers<[1], [0], [0], [1], [0, 0, 1, 1], [], []>} : vector<8x56xbf16>, vector<56x128xbf16>, vector<8x128xf32> -> vector<8x128xf32>
    %46 = arith.addf %43, %45 : vector<8x128xf32>
    %c0_31 = arith.constant 0 : index
    %c0_32 = arith.constant 0 : index
    %47 = vector.load %arg16[%c0_31, %c0_32] : memref<8x128xf32, #tpu.memory_space<vmem>>, vector<8x128xf32>
    tpu.vector_store %arg16[%c0_31, %c0_32], %46 {strides = array<i32>} : memref<8x128xf32, #tpu.memory_space<vmem>>, vector<8x128xf32>,
    %c0_i32_33 = arith.constant 0 : i32
    %48 = arith.cmpi eq, %arg0, %c0_i32_33 : i32
    %49 = arith.extui %48 : i1 to i32
    %c0_i32_34 = arith.constant 0 : i32
    %50 = arith.cmpi ne, %49, %c0_i32_34 : i32
    scf.if %50 {
      %c0_35 = arith.constant 0 : index
      %c0_36 = arith.constant 0 : index
      %51 = vector.load %arg9[%c0_35, %c0_36] : memref<8x128xf32, #tpu.memory_space<vmem>>, vector<8x128xf32>
      %c0_37 = arith.constant 0 : index
      %c0_38 = arith.constant 0 : index
      %52 = vector.load %arg16[%c0_37, %c0_38] : memref<8x128xf32, #tpu.memory_space<vmem>>, vector<8x128xf32>
      %53 = arith.truncf %52 : vector<8x128xf32> to vector<8x128xbf16>
      %c0_39 = arith.constant 0 : index
      %c0_40 = arith.constant 0 : index
      %54 = vector.load %arg10[%c0_39, %c0_40] : memref<128x128xbf16, #tpu.memory_space<vmem>>, vector<128x128xbf16>
      %cst_41 = arith.constant dense<0.000000e+00> : vector<8x128xf32>
      %55 = tpu.matmul %53, %54, %cst_41 {dimension_numbers = #tpu.dot_dimension_numbers<[1], [0], [0], [1], [0, 0, 1, 1], [], []>} : vector<8x128xbf16>, vector<128x128xbf16>, vector<8x128xf32> -> vector<8x128xf32>
      %56 = arith.addf %51, %55 : vector<8x128xf32>
      %c0_42 = arith.constant 0 : index
      %c0_43 = arith.constant 0 : index
      %57 = vector.load %arg11[%c0_42, %c0_43] : memref<1x128xf32, #tpu.memory_space<vmem>>, vector<1x128xf32>
      %58 = vector.broadcast %57 : vector<1x128xf32> to vector<8x128xf32>
      %59 = arith.addf %56, %58 : vector<8x128xf32>
      %cst_44 = arith.constant 0.000000e+00 : f32
      %60 = vector.broadcast %cst_44 : f32 to vector<8x128xf32>
      %61 = arith.maximumf %59, %60 : vector<8x128xf32>
      %62 = arith.truncf %61 : vector<8x128xf32> to vector<8x128xbf16>
      %c0_45 = arith.constant 0 : index
      %c0_46 = arith.constant 0 : index
      %63 = vector.load %arg12[%c0_45, %c0_46] : memref<128x128xbf16, #tpu.memory_space<vmem>>, vector<128x128xbf16>
      %cst_47 = arith.constant dense<0.000000e+00> : vector<8x128xf32>
      %64 = tpu.matmul %62, %63, %cst_47 {dimension_numbers = #tpu.dot_dimension_numbers<[1], [0], [0], [1], [0, 0, 1, 1], [], []>} : vector<8x128xbf16>, vector<128x128xbf16>, vector<8x128xf32> -> vector<8x128xf32>
      %c0_48 = arith.constant 0 : index
      %c0_49 = arith.constant 0 : index
      %65 = vector.load %arg13[%c0_48, %c0_49] : memref<1x128xf32, #tpu.memory_space<vmem>>, vector<1x128xf32>
      %66 = vector.broadcast %65 : vector<1x128xf32> to vector<8x128xf32>
      %67 = arith.addf %64, %66 : vector<8x128xf32>
      %c0_50 = arith.constant 0 : index
      %c0_51 = arith.constant 0 : index
      %68 = vector.load %arg14[%c0_50, %c0_51] : memref<8x128xf32, #tpu.memory_space<vmem>>, vector<8x128xf32>
      tpu.vector_store %arg14[%c0_50, %c0_51], %67 {strides = array<i32>} : memref<8x128xf32, #tpu.memory_space<vmem>>, vector<8x128xf32>,
    } else {
    }
    return
  }
  func.func @transform_0(%arg0: i32) -> (i32, i32) {
    %c0_i32 = arith.constant 0 : i32
    %c0_i32_0 = arith.constant 0 : i32
    return %arg0, %c0_i32 : i32, i32
  }
  func.func @transform_1(%arg0: i32) -> (i32, i32) {
    %c0_i32 = arith.constant 0 : i32
    %c0_i32_0 = arith.constant 0 : i32
    return %arg0, %c0_i32 : i32, i32
  }
  func.func @transform_2(%arg0: i32) -> (i32, i32) {
    %c0_i32 = arith.constant 0 : i32
    %c0_i32_0 = arith.constant 0 : i32
    return %c0_i32, %arg0 : i32, i32
  }
  func.func @transform_3(%arg0: i32) -> (i32, i32) {
    %c0_i32 = arith.constant 0 : i32
    %c0_i32_0 = arith.constant 0 : i32
    %c0_i32_1 = arith.constant 0 : i32
    return %c0_i32, %c0_i32_0 : i32, i32
  }
  func.func @transform_4(%arg0: i32) -> (i32, i32) {
    %c0_i32 = arith.constant 0 : i32
    %c0_i32_0 = arith.constant 0 : i32
    %c0_i32_1 = arith.constant 0 : i32
    return %c0_i32, %c0_i32_0 : i32, i32
  }
  func.func @transform_5(%arg0: i32) -> (i32, i32) {
    %c0_i32 = arith.constant 0 : i32
    %c0_i32_0 = arith.constant 0 : i32
    %c0_i32_1 = arith.constant 0 : i32
    return %c0_i32, %c0_i32_0 : i32, i32
  }
  func.func @transform_6(%arg0: i32) -> (i32, i32) {
    %c0_i32 = arith.constant 0 : i32
    %c0_i32_0 = arith.constant 0 : i32
    %c0_i32_1 = arith.constant 0 : i32
    return %c0_i32, %c0_i32_0 : i32, i32
  }
  func.func @transform_7(%arg0: i32) -> (i32, i32) {
    %c0_i32 = arith.constant 0 : i32
    %c0_i32_0 = arith.constant 0 : i32
    %c0_i32_1 = arith.constant 0 : i32
    return %c0_i32, %c0_i32_0 : i32, i32
  }
  func.func @transform_8(%arg0: i32) -> (i32, i32) {
    %c0_i32 = arith.constant 0 : i32
    %c0_i32_0 = arith.constant 0 : i32
    %c0_i32_1 = arith.constant 0 : i32
    return %c0_i32, %c0_i32_0 : i32, i32
  }
  func.func @transform_9(%arg0: i32) -> (i32, i32) {
    %c0_i32 = arith.constant 0 : i32
    %c0_i32_0 = arith.constant 0 : i32
    %c0_i32_1 = arith.constant 0 : i32
    return %c0_i32, %c0_i32_0 : i32, i32
  }
  func.func @transform_10(%arg0: i32) -> (i32, i32) {
    %c0_i32 = arith.constant 0 : i32
    %c0_i32_0 = arith.constant 0 : i32
    %c0_i32_1 = arith.constant 0 : i32
    return %c0_i32, %c0_i32_0 : i32, i32
  }
  func.func @transform_11(%arg0: i32) -> (i32, i32) {
    %c0_i32 = arith.constant 0 : i32
    %c0_i32_0 = arith.constant 0 : i32
    %c0_i32_1 = arith.constant 0 : i32
    return %c0_i32, %c0_i32_0 : i32, i32
  }
  func.func @transform_12(%arg0: i32) -> (i32, i32) {
    %c0_i32 = arith.constant 0 : i32
    %c0_i32_0 = arith.constant 0 : i32
    %c0_i32_1 = arith.constant 0 : i32
    return %c0_i32, %c0_i32_0 : i32, i32
  }
  func.func @transform_13(%arg0: i32) -> (i32, i32) {
    %c0_i32 = arith.constant 0 : i32
    %c0_i32_0 = arith.constant 0 : i32
    %c0_i32_1 = arith.constant 0 : i32
    return %c0_i32, %c0_i32_0 : i32, i32
  }
  func.func @transform_14(%arg0: i32) -> (i32, i32) {
    %c0_i32 = arith.constant 0 : i32
    %c0_i32_0 = arith.constant 0 : i32
    return %arg0, %c0_i32 : i32, i32
  }
}

</mosaic_0001>

<bundles_post_ra>
// kernel: gcl_forward.1
= control target key start
LH: loop header
LB: loop body
LE: loop exit
PB: predicated region body
PF: predicated region fallthrough
CT: control target
= control target key end

     0   :  { %v810_v2 = vmov 0   ;;  %s1087_s0 = inlined_call_operand.vmem [shape: s32[56,1], index: 0, kind: input, shape index: {}]   ;;  %s1088_s1 = inlined_call_operand.vmem [shape: s32[56,1], index: 1, kind: input, shape index: {}]   ;;  %s1089_s2 = inlined_call_operand.vmem [shape: s32[1,56], index: 2, kind: input, shape index: {}]   ;;  %s1090_s3 = inlined_call_operand.vmem [shape: bf16[8,128], index: 3, kind: input, shape index: {}]   ;;  %s1091_s4 = inlined_call_operand.vmem [shape: bf16[8,128], index: 4, kind: input, shape index: {}]   ;;  %s1092_s5 = inlined_call_operand.vmem [shape: f32[1,128], index: 5, kind: input, shape index: {}]   ;;  %s1093_s6 = inlined_call_operand.vmem [shape: bf16[128,128], index: 6, kind: input, shape index: {}]   ;;  %s1094_s7 = inlined_call_operand.vmem [shape: f32[1,128], index: 7, kind: input, shape index: {}]   ;;  %s1095_s8 = inlined_call_operand.vmem [shape: f32[8,128], index: 8, kind: input, shape index: {}]   ;;  %s1096_s9 = inlined_call_operand.vmem [shape: bf16[128,128], index: 9, kind: input, shape index: {}]   ;;  %s1097_s10 = inlined_call_operand.vmem [shape: f32[1,128], index: 10, kind: input, shape index: {}]   ;;  %s1098_s11 = inlined_call_operand.vmem [shape: bf16[128,128], index: 11, kind: input, shape index: {}]   ;;  %s1099_s12 = inlined_call_operand.vmem [shape: f32[1,128], index: 12, kind: input, shape index: {}]   ;;  %s1100_s13 = inlined_call_operand.hbm [shape: f32[8,128], index: 13, kind: output, shape index: {0}]   ;;  %s1101_s14 = inlined_call_operand.vmem [shape: f32[56,128], index: 14, kind: output, shape index: {1}]  }
   0x1   :  { %v127_v0 = vld [vmem:[%s1088_s1] sm:$0xff]  ;;  %777 = vset.pattern.permute.xlu1 %v810_v2  ;;  %776 = vset.pattern.permute.xlu0 %v810_v2  ;;  %v76_v3 = vld [vmem:[%s1087_s0 + $0x10] sm:$0xff] }
   0x2   :  { %v74_v1 = vld [vmem:[%s1087_s0] sm:$0xff]  ;;  %135 = vperm.xlu1 %777, %v127_v0   ;;  %778 = vset.pattern.permute.xlu2 %v810_v2 }
   0x3   :  { %82 = vperm.xlu0 %776, %v74_v1   ;;  %88 = vperm.xlu2 %778, %v76_v3  }
   0x4   :  { %20 = vsyncpa [#allocation6], 0  ;;  %v128_v4 = vld [vmem:[%s1088_s1 + $0x8] sm:$0xff]  ;;  %v77_v6 = vld [vmem:[%s1087_s0 + $0x18] sm:$0xff]  ;;  %v53_v15 = vlaneseq  ;;  %vm55_vm0 = vcmask 64512   ;;  %vm202_vm1 = vcmask 1043456  }
   0x5   :  { %v75_v5 = vld [vmem:[%s1087_s0 + $0x8] sm:$0xff]  ;;  %v130_v7 = vld [vmem:[%s1088_s1 + $0x18] sm:$0xff]  ;;  %v129_v8 = vld [vmem:[%s1088_s1 + $0x10] sm:$0xff]  ;;  %v811_v28 = vmov 0.0  }
   0x6   :  { %v78_v9 = vld [vmem:[%s1087_s0 + $0x20] sm:$0xff]  ;;  %v79_v11 = vld [vmem:[%s1087_s0 + $0x28] sm:$0xff]  ;;  %v133_v13 = vld [vmem:[%s1088_s1 + $0x30] sm:$0xff]  ;;  %v54_v16 = vand.u32 127, %v53_v15 }
   0x7   :  { %v131_v10 = vld [vmem:[%s1088_s1 + $0x20] sm:$0xff]  ;;  %v132_v12 = vld [vmem:[%s1088_s1 + $0x28] sm:$0xff]  ;;  %v80_v14 = vld [vmem:[%s1087_s0 + $0x30] sm:$0xff] }
   0x8   :  { %58 = vst.msk [vmem:[#allocation3 + $0x10] sm:$0xff] %vm55_vm0, %v54_v16  ;;  %v188_v17 = vld [vmem:[%s1091_s4] sm:$0xf]  ;;  %v756_v47 = vld [vmem:[%s1093_s6 + $0x38] sm:$0xff]  ;;  %v755_v48 = vld [vmem:[%s1093_s6 + $0x30] sm:$0xff] }
   0x9   :  { %56 = vst.msk [vmem:[#allocation3] sm:$0xff] %vm55_vm0, %v54_v16  ;;  %v187_v18 = vld [vmem:[%s1090_s3] sm:$0xf]  ;;  %v204_v19 = vsel %vm202_vm1, %v188_v17, 0  ;;  %367 = vmatpush.bf16.msra.mxu2 %v756_v47  ;;  %v754_v51 = vld [vmem:[%s1093_s6 + $0x28] sm:$0xff] }
   0xa   :  { %138 = vperm.xlu1 %777, %v128_v4   ;;  %57 = vst.msk [vmem:[#allocation3 + $0x8] sm:$0xff] %vm55_vm0, %v54_v16  ;;  %v247_v20 = vsel %vm202_vm1, %v187_v18, 0  ;;  %213 = vmatpush.bf16.msra.mxu0 %v204_v19  ;;  %v753_v55 = vld [vmem:[%s1093_s6 + $0x20] sm:$0xff] }
   0xb   :  { %85 = vperm.xlu0 %776, %v75_v5   ;;  %91 = vperm.xlu2 %778, %v77_v6   ;;  %59 = vst.msk [vmem:[#allocation3 + $0x18] sm:$0xff] %vm55_vm0, %v54_v16  ;;  %v752_v5 = vld [vmem:[%s1093_s6 + $0x18] sm:$0xff]  ;;  %v751_v6 = vld [vmem:[%s1093_s6 + $0x10] sm:$0xff] }
   0xc   :  { %60 = vst.msk [vmem:[#allocation3 + $0x20] sm:$0xff] %vm55_vm0, %v54_v16  ;;  %256 = vmatpush.bf16.msra.mxu1 %v247_v20 }
   0xd   :  { %61 = vst.msk [vmem:[#allocation3 + $0x28] sm:$0xff] %vm55_vm0, %v54_v16  ;;  %368 = vmatpush.bf16.msra.mxu2 %v755_v48 }
   0xe   :  { %62 = vst.msk [vmem:[#allocation3 + $0x30] sm:$0xff] %vm55_vm0, %v54_v16 }
   0xf   :  { %v69_v36 = vld [vmem:[#allocation3 + $0x10] sm:$0xff] }
  0x10   :  { %v67_v23 = vld [vmem:[#allocation3] sm:$0xff] }
  0x11   :  { %v68_v25 = vld [vmem:[#allocation3 + $0x8] sm:$0xff]  ;;  %369 = vmatpush.bf16.msra.mxu2 %v754_v51 }
  0x12   :  { %144 = vperm.xlu1 %777, %v130_v7   ;;  %v70_v37 = vld [vmem:[#allocation3 + $0x18] sm:$0xff]  ;;  %v750_v7 = vld [vmem:[%s1093_s6 + $0x8] sm:$0xff] }
  0x13   :  { %141 = vperm.xlu0 %776, %v129_v8   ;;  %94 = vperm.xlu2 %778, %v78_v9   ;;  %v71_v52 = vld [vmem:[#allocation3 + $0x20] sm:$0xff] }
  0x14   :  { %v72_v54 = vld [vmem:[#allocation3 + $0x28] sm:$0xff]  ;;  %v749_v8 = vld [vmem:[%s1093_s6] sm:$0xff] }
  0x15   :  { %370 = vmatpush.bf16.msra.mxu2 %v753_v55  ;;  %v73_v63 = vld [vmem:[#allocation3 + $0x30] sm:$0xff] }
  0x19   :  { %371 = vmatpush.bf16.msra.mxu2 %v752_v5 }
  0x1a   :  { %147 = vperm.xlu1 %777, %v131_v10  }
  0x1b   :  { %97 = vperm.xlu0 %776, %v79_v11   ;;  %150 = vperm.xlu2 %778, %v132_v12   ;;  %v779_v12 = vld [vmem:[%s1092_s5] ss:$0 sm:$0xff] }
  0x1d   :  { %372 = vmatpush.bf16.msra.mxu2 %v751_v6 }
  0x21   :  { %373 = vmatpush.bf16.msra.mxu2 %v750_v7 }
  0x22   :  { %153 = vperm.xlu1 %777, %v133_v13  }
  0x23   :  { %100 = vperm.xlu0 %776, %v80_v14  }
  0x25   :  { %374 = vmatpush.bf16.msra.mxu2 %v749_v8 }
  0x5d   :  { %v89_v24 = vpop.permute.xlu2 %88 }
  0x5e   :  { %vm104_vm6 = vcmp.eq.s32.totalorder %v69_v36, %v89_v24 }
  0x5f   :  { %v631_v40 = vsel %vm104_vm6, 1.0, %v811_v28 }
  0x65   :  { %v92_v35 = vpop.permute.xlu2 %91 }
  0x66   :  { %vm105_vm7 = vcmp.eq.s32.totalorder %v70_v37, %v92_v35 }
  0x67   :  { %v632_v41 = vsel %vm105_vm7, 1.0, %v811_v28 }
  0x68   :  { %v124_v45 = vpack.c.bf16 %v632_v41, %v631_v40 }
  0x6d   :  { %v95_v44 = vpop.permute.xlu2 %94 }
  0x6e   :  { %vm106_vm12 = vcmp.eq.s32.totalorder %v71_v52, %v95_v44 }
  0x6f   :  { %v633_v58 = vsel %vm106_vm12, 1.0, %v811_v28 }
  0x74   :  { %v136_v21 = vpop.permute.xlu1 %135 }
  0x75   :  { %v83_v22 = vpop.permute.xlu0 %82  ;;  %vm155_vm2 = vcmp.eq.s32.totalorder %v67_v23, %v136_v21  ;;  %v151_v53 = vpop.permute.xlu2 %150 }
  0x76   :  { %vm102_vm3 = vcmp.eq.s32.totalorder %v67_v23, %v83_v22  ;;  %v636_v29 = vsel %vm155_vm2, 1.0, %v811_v28  ;;  %vm160_vm13 = vcmp.eq.s32.totalorder %v72_v54, %v151_v53  ;;  %v780_v53 = vld [vmem:[%s1094_s7] ss:$0 sm:$0xff] }
  0x77   :  { %v629_v30 = vsel %vm102_vm3, 1.0, %v811_v28  ;;  %v641_v59 = vsel %vm160_vm13, 1.0, %v811_v28 }
  0x7c   :  { %v139_v26 = vpop.permute.xlu1 %138 }
  0x7d   :  { %v86_v27 = vpop.permute.xlu0 %85  ;;  %vm156_vm4 = vcmp.eq.s32.totalorder %v68_v25, %v139_v26 }
  0x7e   :  { %vm103_vm5 = vcmp.eq.s32.totalorder %v68_v25, %v86_v27  ;;  %v637_v31 = vsel %vm156_vm4, 1.0, %v811_v28 }
  0x7f   :  { %v630_v32 = vsel %vm103_vm5, 1.0, %v811_v28  ;;  %v176_v33 = vpack.c.bf16 %v637_v31, %v636_v29 }
  0x80   :  { %v123_v34 = vpack.c.bf16 %v630_v32, %v629_v30 }
  0x81   :  { %644 = vmatmul.msk.bf16.vlgmr.msra.gmra.mxu0 %vm55_vm0, %v176_v33 }
  0x82   :  { %648 = vmatmul.msk.bf16.vlgmr.msra.gmra.mxu1 %vm55_vm0, %v123_v34 }
  0x84   :  { %v145_v38 = vpop.permute.xlu1 %144 }
  0x85   :  { %v142_v39 = vpop.permute.xlu0 %141  ;;  %vm158_vm8 = vcmp.eq.s32.totalorder %v70_v37, %v145_v38 }
  0x86   :  { %vm157_vm9 = vcmp.eq.s32.totalorder %v69_v36, %v142_v39  ;;  %v639_v42 = vsel %vm158_vm8, 1.0, %v811_v28 }
  0x87   :  { %v638_v43 = vsel %vm157_vm9, 1.0, %v811_v28 }
  0x88   :  { %v177_v46 = vpack.c.bf16 %v639_v42, %v638_v43 }
  0x8c   :  { %v148_v49 = vpop.permute.xlu1 %147 }
  0x8d   :  { %v98_v50 = vpop.permute.xlu0 %97  ;;  %vm159_vm10 = vcmp.eq.s32.totalorder %v71_v52, %v148_v49 }
  0x8e   :  { %vm107_vm11 = vcmp.eq.s32.totalorder %v72_v54, %v98_v50  ;;  %v640_v56 = vsel %vm159_vm10, 1.0, %v811_v28 }
  0x8f   :  { %v634_v57 = vsel %vm107_vm11, 1.0, %v811_v28  ;;  %v178_v60 = vpack.c.bf16 %v641_v59, %v640_v56 }
  0x90   :  { %v125_v61 = vpack.c.bf16 %v634_v57, %v633_v58 }
  0x91   :  { %645 = vmatmul.msk.bf16.gmra.mxu0 %vm55_vm0, %v177_v46 }
  0x92   :  { %649 = vmatmul.msk.bf16.gmra.mxu1 %vm55_vm0, %v124_v45 }
  0x94   :  { %v154_v62 = vpop.permute.xlu1 %153 }
  0x95   :  { %v101_v0 = vpop.permute.xlu0 %100  ;;  %vm161_vm14 = vcmp.eq.s32.totalorder %v73_v63, %v154_v62 }
  0x96   :  { %vm108_vm15 = vcmp.eq.s32.totalorder %v73_v63, %v101_v0  ;;  %v642_v1 = vsel %vm161_vm14, 1.0, %v811_v28 }
  0x97   :  { %v635_v2 = vsel %vm108_vm15, 1.0, %v811_v28  ;;  %v179_v3 = vpack.c.bf16 %v642_v1, %v642_v1  ;;  %v64_v1 = vshrl.u32 %v53_v15, 7 }
  0x98   :  { %v126_v4 = vpack.c.bf16 %v635_v2, %v635_v2 }
  0xa1   :  { %646 = vmatmul.msk.bf16.gmra.mxu0 %vm55_vm0, %v178_v60 }
  0xa2   :  { %650 = vmatmul.msk.bf16.gmra.mxu1 %vm55_vm0, %v125_v61 }
  0xb1   :  { %647 = vmatmul.msk.bf16.gmra.mxu0 %vm55_vm0, %v179_v3 }
  0xb2   :  { %651 = vmatmul.msk.bf16.gmra.mxu1 %vm55_vm0, %v126_v4  ;;  %vm65_vm0 = vcmask 457728  }
  0xb3   :  { %66 = vst.msk [vmem:[#allocation4] sm:$0xff] %vm65_vm0, %v64_v1 }
  0xfe   :  { %v215_v9 = vpop.f32.mrf.mxu0 }
  0xff   :  { %v258_v10 = vpop.f32.mrf.mxu1 }
 0x100   :  { %v259_v11 = vadd.f32 %v258_v10, %v215_v9 }
 0x102   :  { %v281_v16 = vadd.f32 %v779_v12, %v259_v11 }
 0x104   :  { %v288_v19 = vmax.f32 %v281_v16, 0.0 }
 0x106   :  { %v217_v13 = vpop.f32.mrf.mxu0 }
 0x107   :  { %v260_v14 = vpop.f32.mrf.mxu1 }
 0x108   :  { %v261_v17 = vadd.f32 %v260_v14, %v217_v13  ;;  %v781_v14 = vld [vmem:[%s1089_s2] ss:$0 sm:$0xff] }
 0x10a   :  { %v282_v18 = vadd.f32 %v779_v12, %v261_v17  ;;  %v180_v17 = vld [vmem:[#allocation4] sm:$0xff] }
 0x10b   :  { %vm183_vm2 = vcmp.eq.s32.totalorder %v180_v17, %v781_v14 }
 0x10c   :  { %v289_v20 = vmax.f32 %v282_v18, 0.0 }
 0x10e   :  { %v295_v21 = vpack.c.bf16 %v289_v20, %v288_v19  ;;  %v220_v22 = vpop.f32.mrf.mxu0  ;;  %v643_v19 = vsel %vm183_vm2, 1.0, %v811_v28  ;;  %v764_v20 = vld [vmem:[%s1096_s9 + $0x38] sm:$0xff]  ;;  %v761_v28 = vld [vmem:[%s1096_s9 + $0x20] sm:$0xff] }
 0x10f   :  { %v263_v23 = vpop.f32.mrf.mxu1 }
 0x110   :  { %375 = vmatmul.bf16.vlgmr.msra.gmra.mxu2 %v295_v21  ;;  %v264_v24 = vadd.f32 %v263_v23, %v220_v22  ;;  %v186_v22 = vpack.c.bf16 %v643_v19, %v643_v19  ;;  %v763_v23 = vld [vmem:[%s1096_s9 + $0x30] sm:$0xff] }
 0x112   :  { %v283_v27 = vadd.f32 %v779_v12, %v264_v24  ;;  %v762_v24 = vld [vmem:[%s1096_s9 + $0x28] sm:$0xff] }
 0x114   :  { %v290_v31 = vmax.f32 %v283_v27, 0.0  ;;  %v758_v27 = vld [vmem:[%s1096_s9 + $0x8] sm:$0xff] }
 0x116   :  { %v222_v25 = vpop.f32.mrf.mxu0 }
 0x117   :  { %v265_v26 = vpop.f32.mrf.mxu1 }
 0x118   :  { %v266_v29 = vadd.f32 %v265_v26, %v222_v25  ;;  %v760_v25 = vld [vmem:[%s1096_s9 + $0x18] sm:$0xff]  ;;  %v759_v26 = vld [vmem:[%s1096_s9 + $0x10] sm:$0xff] }
 0x11a   :  { %v284_v30 = vadd.f32 %v779_v12, %v266_v29  ;;  %v757_v29 = vld [vmem:[%s1096_s9] sm:$0xff] }
 0x11c   :  { %v291_v32 = vmax.f32 %v284_v30, 0.0  ;;  %v772_v30 = vld [vmem:[%s1098_s11 + $0x38] sm:$0xff] }
 0x11d   :  { %595 = vmatpush.bf16.msrb.mxu0 %v772_v30 }
 0x11e   :  { %v296_v33 = vpack.c.bf16 %v291_v32, %v290_v31  ;;  %v225_v34 = vpop.f32.mrf.mxu0  ;;  %v771_v31 = vld [vmem:[%s1098_s11 + $0x30] sm:$0xff]  ;;  %v770_v32 = vld [vmem:[%s1098_s11 + $0x28] sm:$0xff] }
 0x11f   :  { %v268_v35 = vpop.f32.mrf.mxu1 }
 0x120   :  { %380 = vmatmul.bf16.gmra.mxu2 %v296_v33  ;;  %v269_v36 = vadd.f32 %v268_v35, %v225_v34  ;;  %v769_v33 = vld [vmem:[%s1098_s11 + $0x20] sm:$0xff]  ;;  %v768_v34 = vld [vmem:[%s1098_s11 + $0x18] sm:$0xff]  ;;  %v767_v35 = vld [vmem:[%s1098_s11 + $0x10] sm:$0xff] }
 0x121   :  { %596 = vmatpush.bf16.msrb.mxu0 %v771_v31 }
 0x122   :  { %v285_v39 = vadd.f32 %v779_v12, %v269_v36  ;;  %v766_v36 = vld [vmem:[%s1098_s11 + $0x8] sm:$0xff] }
 0x124   :  { %v292_v42 = vmax.f32 %v285_v39, 0.0 }
 0x125   :  { %597 = vmatpush.bf16.msrb.mxu0 %v770_v32 }
 0x126   :  { %v227_v37 = vpop.f32.mrf.mxu0 }
 0x127   :  { %v270_v38 = vpop.f32.mrf.mxu1 }
 0x128   :  { %v271_v40 = vadd.f32 %v270_v38, %v227_v37 }
 0x129   :  { %598 = vmatpush.bf16.msrb.mxu0 %v769_v33 }
 0x12a   :  { %v286_v41 = vadd.f32 %v779_v12, %v271_v40  ;;  %v765_v40 = vld [vmem:[%s1098_s11] sm:$0xff]  ;;  %s812_s11 = smov [#allocation5]  }
 0x12b   :  { %s614_s4 = sshll.u32 %s812_s11, 4  ;;  %s615_s4 = int_to_ptr.vmem [resolvable:$true] %s614_s4 }
 0x12c   :  { %v293_v43 = vmax.f32 %v286_v41, 0.0  ;;  %v439_v41 = vld [vmem:[%s1095_s8] sm:$0xff]  ;;  %s616_s8 = sshll.u32 %s1100_s13, 4  ;;  %s617_s8 = int_to_ptr.hbm [resolvable:$true] %s616_s8 }
 0x12d   :  { %599 = vmatpush.bf16.msrb.mxu0 %v768_v34 }
 0x12e   :  { %v297_v44 = vpack.c.bf16 %v293_v43, %v292_v42  ;;  %v230_v45 = vpop.f32.mrf.mxu0  ;;  %v782_v42 = vld [vmem:[%s1097_s10] ss:$0 sm:$0xff] }
 0x12f   :  { %v273_v46 = vpop.f32.mrf.mxu1 }
 0x130   :  { %385 = vmatmul.bf16.gmra.mxu2 %v297_v44  ;;  %v274_v47 = vadd.f32 %v273_v46, %v230_v45 }
 0x131   :  { %600 = vmatpush.bf16.msrb.mxu0 %v767_v35 }
 0x132   :  { %v287_v48 = vadd.f32 %v779_v12, %v274_v47 }
 0x134   :  { %v294_v51 = vmax.f32 %v287_v48, 0.0 }
 0x135   :  { %601 = vmatpush.bf16.msrb.mxu0 %v766_v36 }
 0x136   :  { %v232_v49 = vpop.f32.mrf.mxu0  ;;  %v298_v52 = vpack.c.bf16 %v294_v51, %v294_v51 }
 0x137   :  { %v275_v50 = vpop.f32.mrf.mxu1  ;;  %v783_v49 = vld [vmem:[%s1099_s12] ss:$0 sm:$0xff] }
 0x139   :  { %602 = vmatpush.bf16.msrb.mxu0 %v765_v40 }
 0x140   :  { %390 = vmatmul.bf16.gmra.mxu2 %v298_v52 }
 0x193   :  { %v376_v54 = vpop.f32.mrf.mxu2 }
 0x194   :  { %v377_v55 = vadd.f32 %v780_v53, %v376_v54 }
 0x196   :  { %v395_v56 = vmax.f32 %v377_v55, 0.0 }
 0x198   :  { %402 = vst [vmem:[%s1101_s14] sm:$0xff] %v395_v56 }
 0x19b   :  { %v378_v57 = vpop.f32.mrf.mxu2 }
 0x19c   :  { %v379_v58 = vadd.f32 %v780_v53, %v378_v57 }
 0x19e   :  { %v396_v59 = vmax.f32 %v379_v58, 0.0 }
 0x1a0   :  { %403 = vst [vmem:[%s1101_s14 + $0x8] sm:$0xff] %v396_v59  ;;  %v410_v21 = vpack.c.bf16 %v396_v59, %v395_v56 }
 0x1a3   :  { %v381_v60 = vpop.f32.mrf.mxu2 }
 0x1a4   :  { %v382_v61 = vadd.f32 %v780_v53, %v381_v60 }
 0x1a6   :  { %v397_v62 = vmax.f32 %v382_v61, 0.0 }
 0x1a8   :  { %404 = vst [vmem:[%s1101_s14 + $0x10] sm:$0xff] %v397_v62 }
 0x1ab   :  { %v383_v63 = vpop.f32.mrf.mxu2 }
 0x1ac   :  { %v384_v0 = vadd.f32 %v780_v53, %v383_v63 }
 0x1ae   :  { %v398_v2 = vmax.f32 %v384_v0, 0.0 }
 0x1b0   :  { %405 = vst [vmem:[%s1101_s14 + $0x18] sm:$0xff] %v398_v2  ;;  %v411_v18 = vpack.c.bf16 %v398_v2, %v397_v62 }
 0x1b3   :  { %v386_v3 = vpop.f32.mrf.mxu2 }
 0x1b4   :  { %v387_v4 = vadd.f32 %v780_v53, %v386_v3 }
 0x1b6   :  { %v399_v5 = vmax.f32 %v387_v4, 0.0 }
 0x1b8   :  { %406 = vst [vmem:[%s1101_s14 + $0x20] sm:$0xff] %v399_v5 }
 0x1bb   :  { %v388_v6 = vpop.f32.mrf.mxu2 }
 0x1bc   :  { %v389_v7 = vadd.f32 %v780_v53, %v388_v6 }
 0x1be   :  { %v400_v8 = vmax.f32 %v389_v7, 0.0 }
 0x1c0   :  { %407 = vst [vmem:[%s1101_s14 + $0x28] sm:$0xff] %v400_v8  ;;  %v412_v16 = vpack.c.bf16 %v400_v8, %v399_v5 }
 0x1c3   :  { %v391_v15 = vpop.f32.mrf.mxu2 }
 0x1c4   :  { %v392_v9 = vadd.f32 %v780_v53, %v391_v15 }
 0x1c6   :  { %v401_v10 = vmax.f32 %v392_v9, 0.0 }
 0x1c8   :  { %408 = vst [vmem:[%s1101_s14 + $0x30] sm:$0xff] %v401_v10  ;;  %v413_v11 = vpack.c.bf16 %v401_v10, %v401_v10 }
 0x1ca   :  { %v419_v12 = vsel %vm202_vm1, %v413_v11, 0 }
 0x1cb   :  { %v393_v13 = vpop.f32.mrf.mxu2  ;;  %425 = vmatpush.bf16.msra.mxu3 %v419_v12 }
 0x1cf   :  { %426 = vmatpush.bf16.msra.mxu3 %v412_v16 }
 0x1d3   :  { %427 = vmatpush.bf16.msra.mxu3 %v411_v18 }
 0x1d7   :  { %428 = vmatpush.bf16.msra.mxu3 %v410_v21 }
 0x1da   :  { %684 = vmatmul.msk.bf16.vlgmr.msra.gmra.mxu3 %vm65_vm0, %v186_v22 }
 0x1db   :  { %506 = vmatpush.bf16.msrb.mxu3 %v764_v20 }
 0x1df   :  { %507 = vmatpush.bf16.msrb.mxu3 %v763_v23 }
 0x1e3   :  { %508 = vmatpush.bf16.msrb.mxu3 %v762_v24 }
 0x1e7   :  { %509 = vmatpush.bf16.msrb.mxu3 %v761_v28 }
 0x1eb   :  { %510 = vmatpush.bf16.msrb.mxu3 %v760_v25 }
 0x1ef   :  { %511 = vmatpush.bf16.msrb.mxu3 %v759_v26 }
 0x1f3   :  { %512 = vmatpush.bf16.msrb.mxu3 %v758_v27 }
 0x1f7   :  { %513 = vmatpush.bf16.msrb.mxu3 %v757_v29 }
 0x25d   :  { %v430_v37 = vpop.f32.mrf.mxu3 }
 0x25e   :  { %v441_v38 = vpack.c.bf16 %v430_v37, %v430_v37 }
 0x260   :  { %514 = vmatmul.bf16.vlgmr.msrb.gmra.mxu3 %v441_v38 }
 0x265   :  { %v432_v39 = vpop.f32.mrf.mxu3 }
 0x2e3   :  { %v515_v43 = vpop.f32.mrf.mxu3 }
 0x2e4   :  { %v519_v44 = vadd.f32 %v515_v43, %v439_v41 }
 0x2e6   :  { %v524_v45 = vadd.f32 %v782_v42, %v519_v44 }
 0x2e8   :  { %v525_v46 = vmax.f32 %v524_v45, 0.0 }
 0x2ea   :  { %v526_v47 = vpack.c.bf16 %v525_v46, %v525_v46 }
 0x2eb   :  { %v517_v48 = vpop.f32.mrf.mxu3 }
 0x2ec   :  { %603 = vmatmul.bf16.vlgmr.msrb.gmra.mxu0 %v526_v47 }
 0x369   :  { %v604_v50 = vpop.f32.mrf.mxu0 }
 0x36a   :  { %v605_v51 = vadd.f32 %v783_v49, %v604_v50 }
 0x36c   :  { %608 = vst [vmem:[#allocation5] sm:$0xff] %v605_v51 }
 0x36d   :  { %619 = dma.vmem_to_hbm [thread:$0]  %s615_s4, 128, %s617_s8, [#allocation6]  }
 0x371   :  { %v606_v52 = vpop.f32.mrf.mxu0 }
 0x372   :  { %808 = dma.done.wait [#allocation6], 128  }
 0x373   :  { %809 = vsyncadd [#allocation6], 4294967168 }
 0x374   :  { %628 = vsyncpa [#allocation6], 1 }

</bundles_post_ra>
